<compile_context>
chip_gen: v5e
topology: v5e:2x2
jax: 0.10.0
libtpu: 0.0.40
codegen_flags: <defaults>
</compile_context>

<pallas_src>
import jax
import jax.numpy as jnp
from jax.experimental import pallas as pl
from jax.experimental.pallas import tpu as pltpu

_F32_BYTES = 4
# budget for: 3 inputs x 2 pipeline buffers x (TB, TN) f32 tile
_INPUT_VMEM_BUDGET = 24 * 1024 * 1024


def _myloss_kernel(o_ref, g_ref, m_ref, num_ref, den_ref):
    """One (TB, TN) tile per step.

    grid = (B // TB, N // TN); axis 0 is parallel over batch tiles, axis 1 is
    the (arbitrary) reduction over chunks of the flattened H*W axis, with the
    (TB, 1) output blocks acting as resident accumulators.
    """
    n = pl.program_id(1)

    @pl.when(n == 0)
    def _():
        num_ref[...] = jnp.zeros_like(num_ref)
        den_ref[...] = jnp.zeros_like(den_ref)

    m = m_ref[...]
    # |o*m - g*m| == |(o - g) * m| (exact algebraic identity; saves one vmul/elem)
    diff = jnp.abs((o_ref[...] - g_ref[...]) * m)
    num_ref[...] += jnp.sum(diff, axis=-1, keepdims=True)
    den_ref[...] += jnp.sum(m, axis=-1, keepdims=True)


def _divisors(n):
    return [d for d in range(1, n + 1) if n % d == 0]


def _choose_tiles(B, N):
    """Pick (TB, TN): TN lane-dense chunk of the flattened axis, TB batch rows.

    Block-shape rules honored: TN is a multiple of 128 or the full extent N;
    TB is the full extent B or a multiple-of-8 divisor of B.
    """
    if N % 128 == 0:
        cap_elems = _INPUT_VMEM_BUDGET // (3 * 2 * _F32_BYTES)  # per-row cap
        tn = N
        if N > cap_elems:
            best, d = 128, 128
            while d <= min(N, cap_elems):
                if N % d == 0:
                    best = d
                d += 128
            tn = best
    else:
        # full extent satisfies the layout rule; may be VMEM-heavy for huge,
        # non-128-divisible H*W.
        # TODO(synk): pad the flattened axis when H*W is huge and not a
        # multiple of 128 instead of taking the full extent.
        tn = N

    per_row_bytes = 3 * 2 * tn * _F32_BYTES
    cands = sorted(set([B] + [d for d in _divisors(B) if d % 8 == 0]))
    fitting = [tb for tb in cands if tb * per_row_bytes <= _INPUT_VMEM_BUDGET]
    tb = max(fitting) if fitting else min(cands)
    return tb, tn


def myloss(output, groundtruth, mask):
    B, H, W = output.shape
    N = H * W
    # lane-dense flatten; reductions are invariant to this reshape
    o2 = output.reshape(B, N)
    g2 = groundtruth.reshape(B, N)
    m2 = mask.reshape(B, N)

    tb, tn = _choose_tiles(B, N)
    gb, gn = B // tb, N // tn

    in_spec = pl.BlockSpec((tb, tn), lambda b, n: (b, n))
    out_spec = pl.BlockSpec((tb, 1), lambda b, n: (b, 0))

    tile_bytes = 3 * 2 * tb * tn * _F32_BYTES
    vmem_limit = int(min(64 * 1024 * 1024, max(32 * 1024 * 1024, 2 * tile_bytes)))

    num, den = pl.pallas_call(
        _myloss_kernel,
        out_shape=(
            jax.ShapeDtypeStruct((B, 1), jnp.float32),
            jax.ShapeDtypeStruct((B, 1), jnp.float32),
        ),
        grid_spec=pltpu.PrefetchScalarGridSpec(
            num_scalar_prefetch=0,
            grid=(gb, gn),
            in_specs=[in_spec, in_spec, in_spec],
            out_specs=[out_spec, out_spec],
        ),
        compiler_params=pltpu.CompilerParams(
            dimension_semantics=("parallel", "arbitrary"),
            vmem_limit_bytes=vmem_limit,
        ),
    )(o2, g2, m2)

    # per-batch normalize + mean over batch (tiny, fused by XLA)
    # NOTE: matches the PyTorch module: den == 0 for a batch element -> inf/nan
    return jnp.mean(num[:, 0] / den[:, 0])


def _myloss_ref(output, groundtruth, mask):
    yhat = output * mask
    gtruth = groundtruth * mask
    predot = jnp.sum(mask, axis=(1, 2))
    ans = jnp.sum(jnp.abs(yhat - gtruth), axis=(1, 2)) / predot
    return jnp.mean(ans, axis=0)


if __name__ == "__main__":
    key = jax.random.PRNGKey(0)
    k1, k2, k3 = jax.random.split(key, 3)
    B, H, W = 2, 16, 16
    output = jax.random.normal(k1, (B, H, W), dtype=jnp.float32)
    groundtruth = jax.random.normal(k2, (B, H, W), dtype=jnp.float32)
    # binary mask; guarantee a nonzero denominator per batch element
    mask = (jax.random.uniform(k3, (B, H, W), dtype=jnp.float32) > 0.3).astype(jnp.float32)
    mask = mask.at[:, 0, 0].set(1.0)

    got = jax.block_until_ready(myloss(output, groundtruth, mask))
    want = _myloss_ref(output, groundtruth, mask)
    assert jnp.allclose(got, want, rtol=1e-5, atol=1e-5), (got, want)
    print("KERNEL_OK")
</pallas_src>

<mosaic_0001>
module attributes {stable_mosaic.version = 11 : i64} {
  func.func @_myloss_kernel(%arg0: i32, %arg1: i32, %arg2: memref<2x256xf32, #tpu.memory_space<vmem>>, %arg3: memref<2x256xf32, #tpu.memory_space<vmem>>, %arg4: memref<2x256xf32, #tpu.memory_space<vmem>>, %arg5: memref<2x1xf32, #tpu.memory_space<vmem>>, %arg6: memref<2x1xf32, #tpu.memory_space<vmem>>) attributes {dimension_semantics = [#tpu.dimension_semantics<parallel>, #tpu.dimension_semantics<arbitrary>], iteration_bounds = array<i64: 1, 1>, scalar_prefetch = 0 : i64, scratch_operands = 0 : i64, tpu.core_type = #tpu.core_type<tc>, window_params = [{transform_indices = @transform_0, window_bounds = array<i64: 2, 256>}, {transform_indices = @transform_1, window_bounds = array<i64: 2, 256>}, {transform_indices = @transform_2, window_bounds = array<i64: 2, 256>}, {transform_indices = @transform_3, window_bounds = array<i64: 2, 1>}, {transform_indices = @transform_4, window_bounds = array<i64: 2, 1>}]} {
    %c0_i32 = arith.constant 0 : i32
    %0 = arith.cmpi eq, %arg1, %c0_i32 : i32
    %1 = arith.extui %0 : i1 to i32
    %c0_i32_0 = arith.constant 0 : i32
    %2 = arith.cmpi ne, %1, %c0_i32_0 : i32
    scf.if %2 {
      %cst_15 = arith.constant 0.000000e+00 : f32
      %19 = vector.broadcast %cst_15 : f32 to vector<2x1xf32>
      %c0_16 = arith.constant 0 : index
      %c0_17 = arith.constant 0 : index
      %20 = vector.load %arg5[%c0_16, %c0_17] : memref<2x1xf32, #tpu.memory_space<vmem>>, vector<2x1xf32>
      tpu.vector_store %arg5[%c0_16, %c0_17], %19 {strides = array<i32>} : memref<2x1xf32, #tpu.memory_space<vmem>>, vector<2x1xf32>,
      %cst_18 = arith.constant 0.000000e+00 : f32
      %21 = vector.broadcast %cst_18 : f32 to vector<2x1xf32>
      %c0_19 = arith.constant 0 : index
      %c0_20 = arith.constant 0 : index
      %22 = vector.load %arg6[%c0_19, %c0_20] : memref<2x1xf32, #tpu.memory_space<vmem>>, vector<2x1xf32>
      tpu.vector_store %arg6[%c0_19, %c0_20], %21 {strides = array<i32>} : memref<2x1xf32, #tpu.memory_space<vmem>>, vector<2x1xf32>,
    } else {
    }
    %c0 = arith.constant 0 : index
    %c0_1 = arith.constant 0 : index
    %3 = vector.load %arg4[%c0, %c0_1] : memref<2x256xf32, #tpu.memory_space<vmem>>, vector<2x256xf32>
    %c0_2 = arith.constant 0 : index
    %c0_3 = arith.constant 0 : index
    %4 = vector.load %arg2[%c0_2, %c0_3] : memref<2x256xf32, #tpu.memory_space<vmem>>, vector<2x256xf32>
    %c0_4 = arith.constant 0 : index
    %c0_5 = arith.constant 0 : index
    %5 = vector.load %arg3[%c0_4, %c0_5] : memref<2x256xf32, #tpu.memory_space<vmem>>, vector<2x256xf32>
    %6 = arith.subf %4, %5 : vector<2x256xf32>
    %7 = arith.mulf %6, %3 : vector<2x256xf32>
    %8 = math.absf %7 : vector<2x256xf32>
    %c0_6 = arith.constant 0 : index
    %c0_7 = arith.constant 0 : index
    %9 = vector.load %arg5[%c0_6, %c0_7] : memref<2x1xf32, #tpu.memory_space<vmem>>, vector<2x1xf32>
    %cst = arith.constant dense<0.000000e+00> : vector<2xf32>
    %10 = vector.multi_reduction <add>, %8, %cst [1] : vector<2x256xf32> to vector<2xf32>
    %11 = vector.shape_cast %10 : vector<2xf32> to vector<2x1xf32>
    %12 = arith.addf %9, %11 : vector<2x1xf32>
    %c0_8 = arith.constant 0 : index
    %c0_9 = arith.constant 0 : index
    %13 = vector.load %arg5[%c0_8, %c0_9] : memref<2x1xf32, #tpu.memory_space<vmem>>, vector<2x1xf32>
    tpu.vector_store %arg5[%c0_8, %c0_9], %12 {strides = array<i32>} : memref<2x1xf32, #tpu.memory_space<vmem>>, vector<2x1xf32>,
    %c0_10 = arith.constant 0 : index
    %c0_11 = arith.constant 0 : index
    %14 = vector.load %arg6[%c0_10, %c0_11] : memref<2x1xf32, #tpu.memory_space<vmem>>, vector<2x1xf32>
    %cst_12 = arith.constant dense<0.000000e+00> : vector<2xf32>
    %15 = vector.multi_reduction <add>, %3, %cst_12 [1] : vector<2x256xf32> to vector<2xf32>
    %16 = vector.shape_cast %15 : vector<2xf32> to vector<2x1xf32>
    %17 = arith.addf %14, %16 : vector<2x1xf32>
    %c0_13 = arith.constant 0 : index
    %c0_14 = arith.constant 0 : index
    %18 = vector.load %arg6[%c0_13, %c0_14] : memref<2x1xf32, #tpu.memory_space<vmem>>, vector<2x1xf32>
    tpu.vector_store %arg6[%c0_13, %c0_14], %17 {strides = array<i32>} : memref<2x1xf32, #tpu.memory_space<vmem>>, vector<2x1xf32>,
    return
  }
  func.func @transform_0(%arg0: i32, %arg1: i32) -> (i32, i32) {
    %c0_i32 = arith.constant 0 : i32
    return %arg0, %arg1 : i32, i32
  }
  func.func @transform_1(%arg0: i32, %arg1: i32) -> (i32, i32) {
    %c0_i32 = arith.constant 0 : i32
    return %arg0, %arg1 : i32, i32
  }
  func.func @transform_2(%arg0: i32, %arg1: i32) -> (i32, i32) {
    %c0_i32 = arith.constant 0 : i32
    return %arg0, %arg1 : i32, i32
  }
  func.func @transform_3(%arg0: i32, %arg1: i32) -> (i32, i32) {
    %c0_i32 = arith.constant 0 : i32
    %c0_i32_0 = arith.constant 0 : i32
    return %arg0, %c0_i32 : i32, i32
  }
  func.func @transform_4(%arg0: i32, %arg1: i32) -> (i32, i32) {
    %c0_i32 = arith.constant 0 : i32
    %c0_i32_0 = arith.constant 0 : i32
    return %arg0, %c0_i32 : i32, i32
  }
}

</mosaic_0001>

<bundles_post_ra>
// kernel: tpu_custom_call.1
= control target key start
LH: loop header
LB: loop body
LE: loop exit
PB: predicated region body
PF: predicated region fallthrough
CT: control target
= control target key end

     0   :  { %10 = vsyncpa [#allocation3], 0  ;;  %s250_s0 = inlined_call_operand.hbm [shape: f32[2,256], index: 0, kind: input, shape index: {}]   ;;  %s251_s1 = inlined_call_operand.hbm [shape: f32[2,256], index: 1, kind: input, shape index: {}]   ;;  %s252_s2 = inlined_call_operand.hbm [shape: f32[2,256], index: 2, kind: input, shape index: {}]   ;;  %s253_s3 = inlined_call_operand.vmem [shape: f32[2,1], index: 3, kind: output, shape index: {0}]   ;;  %s254_s4 = inlined_call_operand.vmem [shape: f32[2,1], index: 4, kind: output, shape index: {1}]  }
   0x1   :  { %11 = vsyncpa [#allocation5], 0  ;;  %s28_s17 = sshll.u32 %s251_s1, 4  ;;  %s190_s18 = smov [#allocation4]   ;;  %s29_s17 = int_to_ptr.hbm [resolvable:$true] %s28_s17 }
   0x2   :  { %s30_s19 = sshll.u32 %s190_s18, 4  ;;  %s17_s22 = sshll.u32 %s250_s0, 4  ;;  %s31_s19 = int_to_ptr.vmem [resolvable:$true] %s30_s19  ;;  %s18_s22 = int_to_ptr.hbm [resolvable:$true] %s17_s22 }
   0x3   :  { %33 = dma.hbm_to_vmem [thread:$0]  %s29_s17, 64, %s31_s19, [#allocation5]  }
   0x4   :  { %s191_s23 = smov [#allocation2]   ;;  %s39_s27 = sshll.u32 %s252_s2, 4  ;;  %s40_s27 = int_to_ptr.hbm [resolvable:$true] %s39_s27 }
   0x5   :  { %s19_s24 = sshll.u32 %s191_s23, 4  ;;  %s192_s1 = smov [#allocation6]   ;;  %s20_s24 = int_to_ptr.vmem [resolvable:$true] %s19_s24 }
   0x6   :  { %22 = dma.hbm_to_vmem [thread:$0]  %s18_s22, 64, %s20_s24, [#allocation3]  }
   0x7   :  { %s41_s28 = sshll.u32 %s192_s1, 4  ;;  %s42_s28 = int_to_ptr.vmem [resolvable:$true] %s41_s28 }
   0x8   :  { %44 = dma.hbm_to_vmem [thread:$0]  %s40_s27, 64, %s42_s28, [#allocation5]  }
   0x9   :  { %186 = dma.done.wait [#allocation3], 64  }
   0xa   :  { %187 = vsyncadd [#allocation3], 4294967232 }
   0xb   :  { %188 = dma.done.wait [#allocation5], 128  }
   0xc   :  { %189 = vsyncadd [#allocation5], 4294967168  ;;  %vm61_vm0 = vcmask 1024   ;;  %v193_v0 = vmov 0.0   ;;  %v64_v1 = vld [vmem:[#allocation6] sm:$0xf] }
   0xd   :  { %62 = vst.msk [vmem:[%s253_s3] sm:$0x3] %vm61_vm0, %v193_v0  ;;  %v65_v2 = vld [vmem:[#allocation2] sm:$0xf]  ;;  %v66_v3 = vld [vmem:[#allocation4] sm:$0xf] }
   0xe   :  { %63 = vst.msk [vmem:[%s254_s4] sm:$0x3] %vm61_vm0, %v193_v0  ;;  %v67_v4 = vsub.f32 %v65_v2, %v66_v3  ;;  %vm77_vm1 = vcmask 1041408  }
  0x10   :  { %v68_v5 = vmul.f32 %v67_v4, %v64_v1 }
  0x12   :  { %v69_v6 = vand.u32 2147483647, %v68_v5 }
  0x14   :  { %72 = vst [vmem:[#allocation1] ss:$4 sm:$0xff] %v69_v6  ;;  %v70_v17 = vld [vmem:[%s253_s3] sm:$0x3] }
  0x15   :  { %v86_v20 = vld [vmem:[%s254_s4] sm:$0x3] }
  0x1b   :  { %v73_v7 = vld.sshfl [vmem:[#allocation1] sm:$0xff pattern:$0x73625140]  ;;  %v74_v8 = vld.sshfl [vmem:[#allocation1 + $0x8] sm:$0xff pattern:$0x73625140] }
  0x1c   :  { %v78_v9 = vsel %vm77_vm1, %v73_v7, 0.0  ;;  %v79_v10 = vsel %vm77_vm1, %v74_v8, 0.0  ;;  %88 = vst [vmem:[#allocation1] ss:$4 sm:$0xff] %v64_v1 }
  0x1d   :  { %v80_v11 = vadd.f32 %v79_v10, %v78_v9 }
  0x1f   :  { %81 = vadd.xlane.f32.xlu0 %v80_v11 }
  0x23   :  { %v89_v12 = vld.sshfl [vmem:[#allocation1] sm:$0xff pattern:$0x73625140]  ;;  %v90_v13 = vld.sshfl [vmem:[#allocation1 + $0x8] sm:$0xff pattern:$0x73625140] }
  0x24   :  { %v93_v14 = vsel %vm77_vm1, %v89_v12, 0.0  ;;  %v94_v15 = vsel %vm77_vm1, %v90_v13, 0.0 }
  0x25   :  { %v95_v16 = vadd.f32 %v94_v15, %v93_v14 }
  0x27   :  { %96 = vadd.xlane.f32.xlu0 %v95_v16 }
  0x92   :  { %v82_v18 = vpop.xlane.xlu0 %81 }
  0x93   :  { %v83_v19 = vadd.f32 %v82_v18, %v70_v17 }
  0x95   :  { %85 = vst.msk [vmem:[%s253_s3] sm:$0x3] %vm61_vm0, %v83_v19 }
  0x9a   :  { %v97_v21 = vpop.xlane.xlu0 %96 }
  0x9b   :  { %v98_v22 = vadd.f32 %v97_v21, %v86_v20 }
  0x9d   :  { %99 = vst.msk [vmem:[%s254_s4] sm:$0x3] %vm61_vm0, %v98_v22 }
  0x9e   :  { %108 = vsyncpa [#allocation3], 1 }
  0x9f   :  { %109 = vsyncpa [#allocation5], 1 }

</bundles_post_ra>
